<compile_context>
chip_gen: v6e
topology: v6e:2x2x1
jax: 0.10.0
libtpu: 0.0.40
codegen_flags: <defaults>
</compile_context>

<pallas_src>
import functools

import jax
import jax.numpy as jnp
from jax.experimental import pallas as pl
from jax.experimental.pallas import tpu as pltpu


def _cnn_kernel(x_ref, w_ref, b_ref, o_ref, *, c_out, l_out):
    """Fused Conv1d -> ReLU -> global max-pool for one batch tile.

    x_ref : (TB, C_in*L)           f32, NCL layout flattened row-major
    w_ref : (C_in*L, l_out*C_out)  bf16, block-Toeplitz folded conv weights
    b_ref : (1, C_out)             f32
    o_ref : (TB, C_out)            f32
    """
    # Single MXU pass: bf16 operands, f32 accumulation.
    conv = jnp.dot(x_ref[...].astype(w_ref.dtype), w_ref[...],
                   preferred_element_type=jnp.float32)      # (TB, l_out*C_out)
    # conv[:, t*C_out + o] == Conv1d output at length position t, channel o.

    # Global max over the length axis first (exact reorder), unrolled over the
    # static l_out positions -- pure VPU work on lane slices.
    pooled = conv[:, 0:c_out]
    for t in range(1, l_out):
        pooled = jnp.maximum(pooled, conv[:, t * c_out:(t + 1) * c_out])

    # Bias + ReLU only on the (TB, C_out) pooled result.
    o_ref[...] = jnp.maximum(pooled + b_ref[...], 0.0).astype(o_ref.dtype)


def cnn_forward(x_ncl, weight, bias, kernel_size, *, batch_tile=128,
                mxu_dtype=jnp.bfloat16):
    """x_ncl: (B, C_in, L) PyTorch NCL layout; weight: (C_out, C_in, K);
    bias: (C_out,).  Returns (B, C_out) float32."""
    b, c_in, length = x_ncl.shape
    c_out, _, k = weight.shape
    assert k == kernel_size
    l_out = length - kernel_size + 1
    assert l_out >= 1, "sequence length must be >= kernel_size"
    assert batch_tile % 8 == 0

    # ---- constant weight/bias plumbing (tiny; hoists/fuses under jit) ------
    # Fold the K conv taps and the NCL layout into one block-Toeplitz matrix:
    #   w_big[c*L + l, t*C_out + o] = weight[o, c, l - t]  for 0 <= l-t < K,
    # else 0, so the whole conv is a single matmul against flattened NCL x.
    w_t = jnp.transpose(weight, (1, 2, 0))                   # (C_in, K, C_out)
    l_idx = jnp.arange(length)[:, None]                      # (L, 1)
    t_idx = jnp.arange(l_out)[None, :]                       # (1, l_out)
    tap = l_idx - t_idx                                      # (L, l_out)
    valid = (tap >= 0) & (tap < kernel_size)
    tap = jnp.clip(tap, 0, kernel_size - 1)
    w_big = jnp.where(valid[None, :, :, None],
                      w_t[:, tap, :], 0.0)                   # (C_in, L, l_out, C_out)
    w_big = w_big.reshape(c_in * length, l_out * c_out).astype(mxu_dtype)
    bias2 = bias.reshape(1, c_out).astype(jnp.float32)

    # ---- x: free row-major flatten; no HBM transpose/cast pass over x ------
    x2 = x_ncl.reshape(b, c_in * length)

    # ---- batch grid ---------------------------------------------------------
    tb = min(batch_tile, max(8, ((b + 7) // 8) * 8))
    n_blocks = pl.cdiv(b, tb)
    b_pad = n_blocks * tb
    if b_pad != b:
        x2 = jnp.pad(x2, ((0, b_pad - b), (0, 0)))

    cost = pl.CostEstimate(
        flops=2 * b_pad * (c_in * length) * (l_out * c_out),
        transcendentals=0,
        bytes_accessed=(x2.size * x2.dtype.itemsize
                        + w_big.size * w_big.dtype.itemsize
                        + bias2.size * 4 + b_pad * c_out * 4),
    )

    kernel = functools.partial(_cnn_kernel, c_out=c_out, l_out=l_out)
    out = pl.pallas_call(
        kernel,
        out_shape=jax.ShapeDtypeStruct((b_pad, c_out), jnp.float32),
        grid_spec=pltpu.PrefetchScalarGridSpec(
            num_scalar_prefetch=0,
            grid=(n_blocks,),
            in_specs=[
                # x: one batch tile per grid step (auto double-buffered).
                pl.BlockSpec((tb, c_in * length), lambda i: (i, 0)),
                # folded weights + bias: same block every step -> VMEM-resident.
                pl.BlockSpec((c_in * length, l_out * c_out), lambda i: (0, 0)),
                pl.BlockSpec((1, c_out), lambda i: (0, 0)),
            ],
            out_specs=pl.BlockSpec((tb, c_out), lambda i: (i, 0)),
        ),
        compiler_params=pltpu.CompilerParams(
            dimension_semantics=("parallel",),   # v7x: shard batch over both TCs
        ),
        cost_estimate=cost,
    )(x2, w_big, bias2)

    return out[:b]


def cnn_reference(x_ncl, weight, bias, kernel_size):
    """Pure-JAX reference mirroring PyTorch Conv1d + ReLU + max_pool1d."""
    conv = jax.lax.conv_general_dilated(
        x_ncl, weight, window_strides=(1,), padding="VALID",
        dimension_numbers=("NCH", "OIH", "NCH"),
        precision=jax.lax.Precision.HIGHEST)
    conv = conv + bias[None, :, None]
    return jnp.max(jax.nn.relu(conv), axis=2)


if __name__ == "__main__":
    embed_char_size = 16    # C_in
    embed_word_size = 32    # C_out
    kernel_size = 5         # K
    seq_len = 16            # L  (>= K)
    batch = 256             # 2 grid steps at batch_tile=128

    key = jax.random.PRNGKey(0)
    kx, kw, kb = jax.random.split(key, 3)

    # Deterministic parameter init (PyTorch Conv1d default: U(-bound, bound)).
    fan_in = embed_char_size * kernel_size
    bound = 1.0 / jnp.sqrt(jnp.float32(fan_in))
    weight = jax.random.uniform(
        kw, (embed_word_size, embed_char_size, kernel_size),
        dtype=jnp.float32, minval=-bound, maxval=bound)
    bias = jax.random.uniform(
        kb, (embed_word_size,), dtype=jnp.float32, minval=-bound, maxval=bound)
    x = jax.random.normal(
        kx, (batch, embed_char_size, seq_len), dtype=jnp.float32)

    fwd = jax.jit(functools.partial(cnn_forward, kernel_size=kernel_size))
    out = jax.block_until_ready(fwd(x, weight, bias))
    assert out.shape == (batch, embed_word_size), out.shape

    # Apples-to-apples reference for the kernel's bf16-operand / f32-accum dot.
    ref_bf16 = cnn_reference(
        x.astype(jnp.bfloat16).astype(jnp.float32),
        weight.astype(jnp.bfloat16).astype(jnp.float32), bias, kernel_size)
    assert jnp.allclose(out, ref_bf16, atol=1e-3, rtol=1e-3), \
        "mismatch vs bf16-rounded reference"

    # Loose sanity check against the pure-f32 reference (bf16 rounding only).
    ref_f32 = cnn_reference(x, weight, bias, kernel_size)
    assert jnp.allclose(out, ref_f32, atol=5e-2, rtol=5e-2), \
        "mismatch vs f32 reference"

    print("KERNEL_OK")
</pallas_src>

<mosaic_0001>
module attributes {stable_mosaic.version = 11 : i64} {
  func.func @_cnn_kernel(%arg0: i32, %arg1: memref<128x256xf32, #tpu.memory_space<vmem>>, %arg2: memref<256x384xbf16, #tpu.memory_space<vmem>>, %arg3: memref<1x32xf32, #tpu.memory_space<vmem>>, %arg4: memref<128x32xf32, #tpu.memory_space<vmem>>) attributes {dimension_semantics = [#tpu.dimension_semantics<parallel>], iteration_bounds = array<i64: 2>, scalar_prefetch = 0 : i64, scratch_operands = 0 : i64, tpu.core_type = #tpu.core_type<tc>, window_params = [{transform_indices = @transform_0, window_bounds = array<i64: 128, 256>}, {pipeline_mode = #tpu.pipeline_mode<synchronous>, transform_indices = @transform_1, window_bounds = array<i64: 256, 384>}, {pipeline_mode = #tpu.pipeline_mode<synchronous>, transform_indices = @transform_2, window_bounds = array<i64: 1, 32>}, {transform_indices = @transform_3, window_bounds = array<i64: 128, 32>}]} {
    %c0 = arith.constant 0 : index
    %c0_0 = arith.constant 0 : index
    %0 = vector.load %arg1[%c0, %c0_0] : memref<128x256xf32, #tpu.memory_space<vmem>>, vector<128x256xf32>
    %1 = arith.truncf %0 : vector<128x256xf32> to vector<128x256xbf16>
    %c0_1 = arith.constant 0 : index
    %c0_2 = arith.constant 0 : index
    %2 = vector.load %arg2[%c0_1, %c0_2] : memref<256x384xbf16, #tpu.memory_space<vmem>>, vector<256x384xbf16>
    %cst = arith.constant dense<0.000000e+00> : vector<128x384xf32>
    %3 = tpu.matmul %1, %2, %cst {dimension_numbers = #tpu.dot_dimension_numbers<[1], [0], [0], [1], [0, 0, 1, 1], [], []>} : vector<128x256xbf16>, vector<256x384xbf16>, vector<128x384xf32> -> vector<128x384xf32>
    %4 = vector.extract_strided_slice %3 {offsets = [0, 0], sizes = [128, 32], strides = [1, 1]} : vector<128x384xf32> to vector<128x32xf32>
    %5 = vector.extract_strided_slice %3 {offsets = [0, 32], sizes = [128, 32], strides = [1, 1]} : vector<128x384xf32> to vector<128x32xf32>
    %6 = arith.maximumf %4, %5 : vector<128x32xf32>
    %7 = vector.extract_strided_slice %3 {offsets = [0, 64], sizes = [128, 32], strides = [1, 1]} : vector<128x384xf32> to vector<128x32xf32>
    %8 = arith.maximumf %6, %7 : vector<128x32xf32>
    %9 = vector.extract_strided_slice %3 {offsets = [0, 96], sizes = [128, 32], strides = [1, 1]} : vector<128x384xf32> to vector<128x32xf32>
    %10 = arith.maximumf %8, %9 : vector<128x32xf32>
    %11 = vector.extract_strided_slice %3 {offsets = [0, 128], sizes = [128, 32], strides = [1, 1]} : vector<128x384xf32> to vector<128x32xf32>
    %12 = arith.maximumf %10, %11 : vector<128x32xf32>
    %13 = vector.extract_strided_slice %3 {offsets = [0, 160], sizes = [128, 32], strides = [1, 1]} : vector<128x384xf32> to vector<128x32xf32>
    %14 = arith.maximumf %12, %13 : vector<128x32xf32>
    %15 = vector.extract_strided_slice %3 {offsets = [0, 192], sizes = [128, 32], strides = [1, 1]} : vector<128x384xf32> to vector<128x32xf32>
    %16 = arith.maximumf %14, %15 : vector<128x32xf32>
    %17 = vector.extract_strided_slice %3 {offsets = [0, 224], sizes = [128, 32], strides = [1, 1]} : vector<128x384xf32> to vector<128x32xf32>
    %18 = arith.maximumf %16, %17 : vector<128x32xf32>
    %19 = vector.extract_strided_slice %3 {offsets = [0, 256], sizes = [128, 32], strides = [1, 1]} : vector<128x384xf32> to vector<128x32xf32>
    %20 = arith.maximumf %18, %19 : vector<128x32xf32>
    %21 = vector.extract_strided_slice %3 {offsets = [0, 288], sizes = [128, 32], strides = [1, 1]} : vector<128x384xf32> to vector<128x32xf32>
    %22 = arith.maximumf %20, %21 : vector<128x32xf32>
    %23 = vector.extract_strided_slice %3 {offsets = [0, 320], sizes = [128, 32], strides = [1, 1]} : vector<128x384xf32> to vector<128x32xf32>
    %24 = arith.maximumf %22, %23 : vector<128x32xf32>
    %25 = vector.extract_strided_slice %3 {offsets = [0, 352], sizes = [128, 32], strides = [1, 1]} : vector<128x384xf32> to vector<128x32xf32>
    %26 = arith.maximumf %24, %25 : vector<128x32xf32>
    %c0_3 = arith.constant 0 : index
    %c0_4 = arith.constant 0 : index
    %27 = vector.load %arg3[%c0_3, %c0_4] : memref<1x32xf32, #tpu.memory_space<vmem>>, vector<1x32xf32>
    %28 = vector.broadcast %27 : vector<1x32xf32> to vector<128x32xf32>
    %29 = arith.addf %26, %28 : vector<128x32xf32>
    %cst_5 = arith.constant 0.000000e+00 : f32
    %30 = vector.broadcast %cst_5 : f32 to vector<128x32xf32>
    %31 = arith.maximumf %29, %30 : vector<128x32xf32>
    %c0_6 = arith.constant 0 : index
    %c0_7 = arith.constant 0 : index
    %32 = vector.load %arg4[%c0_6, %c0_7] : memref<128x32xf32, #tpu.memory_space<vmem>>, vector<128x32xf32>
    tpu.vector_store %arg4[%c0_6, %c0_7], %31 {strides = array<i32>} : memref<128x32xf32, #tpu.memory_space<vmem>>, vector<128x32xf32>,
    return
  }
  func.func @transform_0(%arg0: i32) -> (i32, i32) {
    %c0_i32 = arith.constant 0 : i32
    %c0_i32_0 = arith.constant 0 : i32
    return %arg0, %c0_i32 : i32, i32
  }
  func.func @transform_1(%arg0: i32) -> (i32, i32) {
    %c0_i32 = arith.constant 0 : i32
    %c0_i32_0 = arith.constant 0 : i32
    %c0_i32_1 = arith.constant 0 : i32
    return %c0_i32, %c0_i32_0 : i32, i32
  }
  func.func @transform_2(%arg0: i32) -> (i32, i32) {
    %c0_i32 = arith.constant 0 : i32
    %c0_i32_0 = arith.constant 0 : i32
    %c0_i32_1 = arith.constant 0 : i32
    return %c0_i32, %c0_i32_0 : i32, i32
  }
  func.func @transform_3(%arg0: i32) -> (i32, i32) {
    %c0_i32 = arith.constant 0 : i32
    %c0_i32_0 = arith.constant 0 : i32
    return %arg0, %c0_i32 : i32, i32
  }
}

</mosaic_0001>

<bundles_post_ra>
// kernel: cnn_forward.1
= control target key start
LH: loop header
LB: loop body
LE: loop exit
PB: predicated region body
PF: predicated region fallthrough
CT: control target
= control target key end

     0   :  { %s1756_s12 = smov 0   ;;  %s2598_s0 = inlined_call_operand.vmem [shape: f32[256,256], index: 0, kind: input, shape index: {}]   ;;  %s2599_s1 = inlined_call_operand.vmem [shape: bf16[256,384], index: 1, kind: input, shape index: {}]   ;;  %s2600_s2 = inlined_call_operand.vmem [shape: f32[1,32], index: 2, kind: input, shape index: {}]   ;;  %s2601_s3 = inlined_call_operand.vmem [shape: f32[256,32], index: 3, kind: output, shape index: {}]  }
   0x1 LB: > { %s1524_s13 = sadd.s32 4294967295, %s1731_s12   ;;  %p1528_p0 = scmp.ge.s32.totalorder %s1731_s12, 1  ;;  %s1731_s12 = sphi %s1756_s12, %s13_s12  }
   0x2   : > { %p139_p1 = scmp.lt.s32.totalorder %s1731_s12, 3 }
   0x4   : > { %p140_p2 = pnand %p1528_p0, %p139_p1 }
   0x6   : > { %143 = sbr.rel (%p140_p2) target bundleno = 651 (0x28b), region = 32 }
   0xb   : > { %v1661_v0 = vld [vmem:[%s2599_s1 + $0x170] ss:$12 sps:$4 sm:$0xff]   ;;  %v1663_v2 = vld [vmem:[%s2599_s1 + $0x158] ss:$12 sps:$4 sm:$0xff]   ;;  %v1665_v4 = vld [vmem:[%s2599_s1 + $0x140] ss:$12 sps:$4 sm:$0xff]  }
   0xc   : > { %v1662_v1 = vld [vmem:[%s2599_s1 + $0xb0] ss:$12 sps:$4 sm:$0xff]   ;;  %1586 = vmatprep.subr.bf16.mxu1 %v1661_v0  ;;  %v1664_v3 = vld [vmem:[%s2599_s1 + $0x98] ss:$12 sps:$4 sm:$0xff]   ;;  %v1666_v5 = vld [vmem:[%s2599_s1 + $0x80] ss:$12 sps:$4 sm:$0xff]  }
   0xd   : > { %1587 = vmatpush3.bf16.msra.mxu1 %v1662_v1  ;;  %v1667_v6 = vld [vmem:[%s2599_s1 + $0x128] ss:$12 sps:$4 sm:$0xff]   ;;  %v1669_v7 = vld [vmem:[%s2599_s1 + $0xac] ss:$12 sps:$4 sm:$0xff]   ;;  %s1529_s30 = sshll.u32 %s1524_s13, 4  ;;  %s1734_s16 = smov 64  }
   0xe   : > { %1588 = vmatprep.subr.bf16.mxu1 %v1663_v2  ;;  %v1671_v8 = vld [vmem:[%s2599_s1 + $0xa8] ss:$12 sps:$4 sm:$0xff]   ;;  %546 = vmatprep.subr.bf16.mxu0 %v1669_v7  ;;  %v1672_v10 = vld [vmem:[%s2599_s1 + $0x110] ss:$12 sps:$4 sm:$0xff]   ;;  %p165_p3 = scmp.lt.s32.totalorder %s1529_s30, 31  ;;  %s1735_s17 = smov 32  }
   0xf   : > { %v1668_v9 = vld [vmem:[%s2599_s1 + $0x68] ss:$12 sps:$4 sm:$0xff]   ;;  %547 = vmatpush1.bf16.msra.mxu0 %v1671_v8  ;;  %v1676_v12 = vld [vmem:[%s2599_s1 + $0x90] ss:$12 sps:$4 sm:$0xff]   ;;  %v1681_v15 = vld [vmem:[%s2599_s1 + $0x78] ss:$12 sps:$4 sm:$0xff]  }
  0x10   : > { %v1674_v11 = vld [vmem:[%s2599_s1 + $0x94] ss:$12 sps:$4 sm:$0xff]   ;;  %v1673_v13 = vld [vmem:[%s2599_s1 + $0x50] ss:$12 sps:$4 sm:$0xff]   ;;  %s2621_s30 = smov (!%p165_p3, %s1529_s30), 31  ;;  %vm1451_vm0 = vcmask 261120  }
  0x11   : > { %1589 = vmatpush3.bf16.msra.mxu1 %v1664_v3  ;;  %548 = vmatprep.subr.bf16.mxu0 %v1674_v11  ;;  %v1679_v14 = vld [vmem:[%s2599_s1 + $0x7c] ss:$12 sps:$4 sm:$0xff]   ;;  %v1677_v16 = vld [vmem:[%s2599_s1 + $0xf8] ss:$12 sps:$4 sm:$0xff]   ;;  %s1585_s27 = sshll.u32 %s2621_s30, 4  ;;  %s1533_s20 = sshll.u32 %s2621_s30, 3 }
  0x12   : > { %1590 = vmatprep.subr.bf16.mxu1 %v1665_v4  ;;  %v1678_v17 = vld [vmem:[%s2599_s1 + $0x38] ss:$12 sps:$4 sm:$0xff]   ;;  %v1686_v19 = vld [vmem:[%s2599_s1 + $0x60] ss:$12 sps:$4 sm:$0xff]   ;;  %s1830_s6 = scalar_lea.vmem %s2598_s0, %s1585_s27  ;;  %v1687_v24 = vld [vmem:[%s2599_s1 + $0xc8] ss:$12 sps:$4 sm:$0xff]   ;;  %s2306_s23 = scalar_lea.vmem %s2601_s3, %s1533_s20 }
  0x13   : > { %549 = vmatpush1.bf16.msra.mxu0 %v1676_v12  ;;  %v1684_v18 = vld [vmem:[%s2599_s1 + $0x64] ss:$12 sps:$4 sm:$0xff]   ;;  %v1682_v20 = vld [vmem:[%s2599_s1 + $0xe0] ss:$12 sps:$4 sm:$0xff]   ;;  %v1691_v25 = vld [vmem:[%s2599_s1 + $0x48] ss:$12 sps:$4 sm:$0xff]  }
  0x14   : > { %550 = vmatprep.subr.bf16.mxu0 %v1679_v14  ;;  %v1683_v21 = vld [vmem:[%s2599_s1 + $0x20] ss:$12 sps:$4 sm:$0xff]   ;;  %v181_v26 = vld [vmem:[%s1830_s6 + $0x18] sm:$0xff]  ;;  %v1688_v29 = vld [vmem:[%s2599_s1 + $0x8] ss:$12 sps:$4 sm:$0xff]  }
  0x15   : > { %1591 = vmatpush3.bf16.msra.mxu1 %v1666_v5  ;;  %v1689_v22 = vld [vmem:[%s2599_s1 + $0x4c] ss:$12 sps:$4 sm:$0xff]   ;;  %v1692_v28 = vld [vmem:[%s2599_s1 + $0x34] ss:$12 sps:$4 sm:$0xff]   ;;  %v1694_v32 = vld [vmem:[%s2599_s1 + $0x30] ss:$12 sps:$4 sm:$0xff]  }
  0x16   : > { %1592 = vmatprep.subr.bf16.mxu1 %v1667_v6  ;;  %v179_v23 = vld [vmem:[%s1830_s6 + $0x8] sm:$0xff]  ;;  %v178_v30 = vld [vmem:[%s1830_s6] sm:$0xff]  ;;  %v180_v31 = vld [vmem:[%s1830_s6 + $0x10] sm:$0xff] }
  0x17   : > { %551 = vmatpush1.bf16.msra.mxu0 %v1681_v15  ;;  %v211_v27 = vpack.c.bf16 %v181_v26, %v179_v23  ;;  %v1695_v33 = vld [vmem:[%s2599_s1 + $0x1c] ss:$12 sps:$4 sm:$0xff]   ;;  %v1865_v36 = vpack.c.bf16 %v180_v31, %v178_v30  ;;  %v1697_v37 = vld [vmem:[%s2599_s1 + $0x18] ss:$12 sps:$4 sm:$0xff]   ;;  %v184_v41 = vld [vmem:[%s1830_s6 + $0x30] sm:$0xff] }
  0x18   : > { %552 = vmatprep.subr.bf16.mxu0 %v1684_v18  ;;  %v183_v34 = vld [vmem:[%s1830_s6 + $0x28] sm:$0xff]  ;;  %v185_v35 = vld [vmem:[%s1830_s6 + $0x38] sm:$0xff]  ;;  %v1698_v39 = vld [vmem:[%s2599_s1 + $0x4] ss:$12 sps:$4 sm:$0xff]  }
  0x19   : > { %1593 = vmatpush3.bf16.msra.mxu1 %v1668_v9  ;;  %691 = vmatprep.mubr.bf16.mxu1 %v211_v27  ;;  %v1870_v38 = vpack.c.bf16 %v185_v35, %v183_v34  ;;  %v182_v40 = vld [vmem:[%s1830_s6 + $0x20] sm:$0xff]  ;;  %v1701_v43 = vld [vmem:[%s2599_s1 + $0x16c] ss:$12 sps:$4 sm:$0xff]   ;;  %v1703_v47 = vld [vmem:[%s2599_s1 + $0x168] ss:$12 sps:$4 sm:$0xff]  }
  0x1a   : > { %1594 = vmatprep.subr.bf16.mxu1 %v1672_v10  ;;  %578 = vmatprep.mubr.bf16.mxu0 %v211_v27  ;;  %v1700_v42 = vld [vmem:[%s2599_s1] ss:$12 sps:$4 sm:$0xff]   ;;  %v189_v45 = vld [vmem:[%s1830_s6 + $0x58] sm:$0xff]  ;;  %v1887_v46 = vpack.c.bf16 %v184_v41, %v182_v40  ;;  %v188_v51 = vld [vmem:[%s1830_s6 + $0x50] sm:$0xff] }
  0x1b   : > { %553 = vmatpush1.bf16.msra.mxu0 %v1686_v19  ;;  %v187_v44 = vld [vmem:[%s1830_s6 + $0x48] sm:$0xff]  ;;  %v1704_v49 = vld [vmem:[%s2599_s1 + $0x154] ss:$12 sps:$4 sm:$0xff]   ;;  %v1706_v52 = vld [vmem:[%s2599_s1 + $0x150] ss:$12 sps:$4 sm:$0xff]  }
  0x1c   : > { %554 = vmatprep.subr.bf16.mxu0 %v1689_v22  ;;  %v1892_v48 = vpack.c.bf16 %v189_v45, %v187_v44  ;;  %v186_v50 = vld [vmem:[%s1830_s6 + $0x40] sm:$0xff]  ;;  %v1707_v53 = vld [vmem:[%s2599_s1 + $0x13c] ss:$12 sps:$4 sm:$0xff]   ;;  %v192_v62 = vld [vmem:[%s1830_s6 + $0x70] sm:$0xff] }
  0x1d   : > { %1595 = vmatpush3.bf16.msra.mxu1 %v1673_v13  ;;  %v191_v54 = vld [vmem:[%s1830_s6 + $0x68] sm:$0xff]  ;;  %v193_v55 = vld [vmem:[%s1830_s6 + $0x78] sm:$0xff]  ;;  %v1909_v56 = vpack.c.bf16 %v188_v51, %v186_v50  ;;  %v1710_v59 = vld [vmem:[%s2599_s1 + $0x124] ss:$12 sps:$4 sm:$0xff]  }
  0x1e   : > { %1596 = vmatprep.subr.bf16.mxu1 %v1677_v16  ;;  %v1709_v57 = vld [vmem:[%s2599_s1 + $0x138] ss:$12 sps:$4 sm:$0xff]   ;;  %v1914_v58 = vpack.c.bf16 %v193_v55, %v191_v54  ;;  %v1712_v60 = vld [vmem:[%s2599_s1 + $0x120] ss:$12 sps:$4 sm:$0xff]   ;;  %v1715_v3 = vld [vmem:[%s2599_s1 + $0x108] ss:$12 sps:$4 sm:$0xff]  }
  0x1f   : > { %555 = vmatpush1.bf16.msra.mxu0 %v1691_v25  ;;  %v190_v61 = vld [vmem:[%s1830_s6 + $0x60] sm:$0xff]  ;;  %v1713_v63 = vld [vmem:[%s2599_s1 + $0x10c] ss:$12 sps:$4 sm:$0xff]   ;;  %v1718_v6 = vld [vmem:[%s2599_s1 + $0xf0] ss:$12 sps:$4 sm:$0xff]  }
  0x20   : > { %556 = vmatprep.subr.bf16.mxu0 %v1692_v28  ;;  %v195_v0 = vld [vmem:[%s1830_s6 + $0x88] sm:$0xff]  ;;  %v197_v1 = vld [vmem:[%s1830_s6 + $0x98] sm:$0xff]  ;;  %v216_v2 = vpack.c.bf16 %v192_v62, %v190_v61  ;;  %v1716_v5 = vld [vmem:[%s2599_s1 + $0xf4] ss:$12 sps:$4 sm:$0xff]  }
  0x21   : > { %1597 = vmatpush3.bf16.msra.mxu1 %v1678_v17  ;;  %v219_v4 = vpack.c.bf16 %v197_v1, %v195_v0  ;;  %v194_v7 = vld [vmem:[%s1830_s6 + $0x80] sm:$0xff]  ;;  %v196_v8 = vld [vmem:[%s1830_s6 + $0x90] sm:$0xff]  ;;  %v1719_v9 = vld [vmem:[%s2599_s1 + $0xdc] ss:$12 sps:$4 sm:$0xff]  }
  0x22   : > { %1598 = vmatprep.subr.bf16.mxu1 %v1682_v20  ;;  %v199_v10 = vld [vmem:[%s1830_s6 + $0xa8] sm:$0xff]  ;;  %v201_v11 = vld [vmem:[%s1830_s6 + $0xb8] sm:$0xff]  ;;  %v218_v12 = vpack.c.bf16 %v196_v8, %v194_v7  ;;  %v1722_v15 = vld [vmem:[%s2599_s1 + $0xc4] ss:$12 sps:$4 sm:$0xff]  }
  0x23   : > { %557 = vmatpush1.bf16.msra.mxu0 %v1694_v32  ;;  %v1721_v13 = vld [vmem:[%s2599_s1 + $0xd8] ss:$12 sps:$4 sm:$0xff]   ;;  %v221_v14 = vpack.c.bf16 %v201_v11, %v199_v10  ;;  %v1724_v16 = vld [vmem:[%s2599_s1 + $0xc0] ss:$12 sps:$4 sm:$0xff]   ;;  %v200_v18 = vld [vmem:[%s1830_s6 + $0xb0] sm:$0xff] }
  0x24   : > { %558 = vmatprep.subr.bf16.mxu0 %v1695_v33  ;;  %v198_v17 = vld [vmem:[%s1830_s6 + $0xa0] sm:$0xff]  ;;  %v203_v19 = vld [vmem:[%s1830_s6 + $0xc8] sm:$0xff]  ;;  %v205_v20 = vld [vmem:[%s1830_s6 + $0xd8] sm:$0xff] }
  0x25   : > { %1599 = vmatpush3.bf16.msra.mxu1 %v1683_v21  ;;  %v220_v21 = vpack.c.bf16 %v200_v18, %v198_v17  ;;  %v223_v22 = vpack.c.bf16 %v205_v20, %v203_v19  ;;  %v202_v23 = vld [vmem:[%s1830_s6 + $0xc0] sm:$0xff]  ;;  %v207_v25 = vld [vmem:[%s1830_s6 + $0xe8] sm:$0xff]  ;;  %v209_v26 = vld [vmem:[%s1830_s6 + $0xf8] sm:$0xff] }
  0x26   : > { %1600 = vmatprep.subr.bf16.mxu1 %v1687_v24  ;;  %v204_v24 = vld [vmem:[%s1830_s6 + $0xd0] sm:$0xff]  ;;  %v225_v28 = vpack.c.bf16 %v209_v26, %v207_v25 }
  0x27   : > { %559 = vmatpush1.bf16.msra.mxu0 %v1697_v37  ;;  %v222_v27 = vpack.c.bf16 %v204_v24, %v202_v23  ;;  %v208_v30 = vld [vmem:[%s1830_s6 + $0xf0] sm:$0xff] }
  0x28   : > { %560 = vmatprep.subr.bf16.mxu0 %v1698_v39 }
  0x29   : > { %1601 = vmatpush3.bf16.msra.mxu1 %v1688_v29  ;;  %v206_v29 = vld [vmem:[%s1830_s6 + $0xe0] sm:$0xff]  ;;  %s1733_s6 = smov 96  }
  0x2a   : > { %v224_v31 = vpack.c.bf16 %v208_v30, %v206_v29 }
  0x2b   : > { %561 = vmatpush1.bf16.msra.mxu0 %v1700_v42 }
  0x2c   : > { %692 = vmatmul.mubr.bf16.vlgmr.msra.gmra.mxu1 %v1865_v36  ;;  %562 = vmatprep.subr.bf16.mxu0 %v1701_v43 }
  0x2d   : > { %699 = vmatprep.mubr.bf16.mxu1 %v1870_v38 }
  0x2f   : > { %563 = vmatpush2.bf16.msra.mxu0 %v1703_v47 }
  0x30   : > { %564 = vmatprep.subr.bf16.mxu0 %v1704_v49 }
  0x33   : > { %565 = vmatpush2.bf16.msra.mxu0 %v1706_v52 }
  0x34   : > { %700 = vmatmul.mubr.bf16.gmra.mxu1 %v1887_v46  ;;  %566 = vmatprep.subr.bf16.mxu0 %v1707_v53 }
  0x35   : > { %707 = vmatprep.mubr.bf16.mxu1 %v1892_v48 }
  0x37   : > { %567 = vmatpush2.bf16.msra.mxu0 %v1709_v57 }
  0x38   : > { %568 = vmatprep.subr.bf16.mxu0 %v1710_v59 }
  0x3b   : > { %569 = vmatpush2.bf16.msra.mxu0 %v1712_v60 }
  0x3c   : > { %708 = vmatmul.mubr.bf16.gmra.mxu1 %v1909_v56  ;;  %570 = vmatprep.subr.bf16.mxu0 %v1713_v63 }
  0x3d   : > { %715 = vmatprep.mubr.bf16.mxu1 %v1914_v58 }
  0x3f   : > { %571 = vmatpush2.bf16.msra.mxu0 %v1715_v3 }
  0x40   : > { %572 = vmatprep.subr.bf16.mxu0 %v1716_v5 }
  0x43   : > { %573 = vmatpush2.bf16.msra.mxu0 %v1718_v6 }
  0x44   : > { %716 = vmatmul.mubr.bf16.gmra.mxu1 %v216_v2  ;;  %574 = vmatprep.subr.bf16.mxu0 %v1719_v9 }
  0x45   : > { %723 = vmatprep.mubr.bf16.mxu1 %v219_v4 }
  0x47   : > { %575 = vmatpush2.bf16.msra.mxu0 %v1721_v13 }
  0x48   : > { %576 = vmatprep.subr.bf16.mxu0 %v1722_v15 }
  0x4b   : > { %577 = vmatpush2.bf16.msra.mxu0 %v1724_v16 }
  0x4c   : > { %724 = vmatmul.mubr.bf16.gmra.mxu1 %v218_v12 }
  0x4d   : > { %731 = vmatprep.mubr.bf16.mxu1 %v221_v14 }
  0x4e   : > { %579 = vmatmul.mubr.bf16.vlgmr.msra.gmra.mxu0 %v1865_v36 }
  0x4f   : > { %588 = vmatprep.mubr.bf16.mxu0 %v1870_v38 }
  0x54   : > { %732 = vmatmul.mubr.bf16.gmra.mxu1 %v220_v21 }
  0x55   : > { %739 = vmatprep.mubr.bf16.mxu1 %v223_v22 }
  0x56   : > { %589 = vmatmul.mubr.bf16.gmra.mxu0 %v1887_v46 }
  0x57   : > { %598 = vmatprep.mubr.bf16.mxu0 %v1892_v48 }
  0x5c   : > { %740 = vmatmul.mubr.bf16.gmra.mxu1 %v222_v27 }
  0x5d   : > { %747 = vmatprep.mubr.bf16.mxu1 %v225_v28 }
  0x5e   : > { %599 = vmatmul.mubr.bf16.gmra.mxu0 %v1909_v56 }
  0x5f   : > { %608 = vmatprep.mubr.bf16.mxu0 %v1914_v58 }
  0x64   : > { %748 = vmatmul.mubr.bf16.gmra.mxu1 %v224_v31 }
  0x66   : > { %609 = vmatmul.mubr.bf16.gmra.mxu0 %v216_v2 }
  0x67   : > { %618 = vmatprep.mubr.bf16.mxu0 %v219_v4 }
  0x6e   : > { %619 = vmatmul.mubr.bf16.gmra.mxu0 %v218_v12 }
  0x6f   : > { %628 = vmatprep.mubr.bf16.mxu0 %v221_v14 }
  0x76   : > { %629 = vmatmul.mubr.bf16.gmra.mxu0 %v220_v21 }
  0x77   : > { %638 = vmatprep.mubr.bf16.mxu0 %v223_v22 }
  0x7e   : > { %639 = vmatmul.mubr.bf16.gmra.mxu0 %v222_v27 }
  0x7f   : > { %648 = vmatprep.mubr.bf16.mxu0 %v225_v28 }
  0x86   : > { %649 = vmatmul.mubr.bf16.gmra.mxu0 %v224_v31 }
  0xec   : > { %v1602_v32 = vpop.f32.mrf.mxu1 }
  0xee   : > { %v1603_v33 = vpop.f32.mrf.mxu1 }
  0xef   : > { %v1972_v34 = vadd.f32 %v1603_v33, %v1602_v32 }
  0xf0   : > { %v1605_v35 = vpop.f32.mrf.mxu1 }
  0xf1   : > { %1220 = vrot.lane.b32.xlu0 %v1972_v34, %s1733_s6 }
  0xf2   : > { %v1606_v36 = vpop.f32.mrf.mxu1 }
  0xf3   : > { %v1976_v37 = vadd.f32 %v1606_v36, %v1605_v35 }
  0xf4   : > { %v1608_v38 = vpop.f32.mrf.mxu1 }
  0xf5   : > { %1222 = vrot.lane.b32.xlu1 %v1976_v37, %s1733_s6  ;;  %1284 = vrot.lane.b32.xlu0 %v1972_v34, %s1734_s16 }
  0xf6   : > { %v1609_v39 = vpop.f32.mrf.mxu1 }
  0xf7   : > { %v1986_v42 = vadd.f32 %v1609_v39, %v1608_v38 }
  0xf8   : > { %v1611_v40 = vpop.f32.mrf.mxu1 }
  0xf9   : > { %1286 = vrot.lane.b32.xlu1 %v1976_v37, %s1734_s16  ;;  %1348 = vrot.lane.b32.xlu0 %v1972_v34, %s1735_s17 }
  0xfa   : > { %v1612_v41 = vpop.f32.mrf.mxu1 }
  0xfb   : > { %v1992_v45 = vadd.f32 %v1612_v41, %v1611_v40 }
  0xfc   : > { %v1614_v43 = vpop.f32.mrf.mxu1 }
  0xfd   : > { %1350 = vrot.lane.b32.xlu1 %v1976_v37, %s1735_s17  ;;  %1224 = vrot.lane.b32.xlu0 %v1986_v42, %s1733_s6 }
  0xfe   : > { %v1615_v44 = vpop.f32.mrf.mxu1 }
  0xff   : > { %v2002_v48 = vadd.f32 %v1615_v44, %v1614_v43 }
 0x100   : > { %v1617_v46 = vpop.f32.mrf.mxu1 }
 0x101   : > { %1226 = vrot.lane.b32.xlu1 %v1992_v45, %s1733_s6  ;;  %1288 = vrot.lane.b32.xlu0 %v1986_v42, %s1734_s16 }
 0x102   : > { %v1618_v47 = vpop.f32.mrf.mxu1 }
 0x103   : > { %v2008_v50 = vadd.f32 %v1618_v47, %v1617_v46 }
 0x104   : > { %v1620_v49 = vpop.f32.mrf.mxu1 }
 0x105   : > { %1290 = vrot.lane.b32.xlu1 %v1992_v45, %s1734_s16  ;;  %1352 = vrot.lane.b32.xlu0 %v1986_v42, %s1735_s17 }
 0x106   : > { %v1621_v51 = vpop.f32.mrf.mxu1 }
 0x107   : > { %v2018_v53 = vadd.f32 %v1621_v51, %v1620_v49 }
 0x108   : > { %v1623_v52 = vpop.f32.mrf.mxu1 }
 0x109   : > { %1354 = vrot.lane.b32.xlu1 %v1992_v45, %s1735_s17  ;;  %1228 = vrot.lane.b32.xlu0 %v2002_v48, %s1733_s6 }
 0x10a   : > { %v1624_v54 = vpop.f32.mrf.mxu1 }
 0x10b   : > { %v2024_v55 = vadd.f32 %v1624_v54, %v1623_v52 }
 0x10c   : > { %v1626_v60 = vpop.f32.mrf.mxu1 }
 0x10d   : > { %1230 = vrot.lane.b32.xlu1 %v2008_v50, %s1733_s6  ;;  %1292 = vrot.lane.b32.xlu0 %v2002_v48, %s1734_s16 }
 0x10e   : > { %v2030_v56 = vpop.f32.mrf.mxu0  ;;  %v1627_v61 = vpop.f32.mrf.mxu1 }
 0x10f   : > { %v2072_v1 = vadd.f32 %v1627_v61, %v1626_v60 }
 0x110   : > { %v2036_v57 = vpop.f32.mrf.mxu0  ;;  %v1629_v62 = vpop.f32.mrf.mxu1 }
 0x111   : > { %1294 = vrot.lane.b32.xlu1 %v2008_v50, %s1734_s16  ;;  %1356 = vrot.lane.b32.xlu0 %v2002_v48, %s1735_s17  ;;  %2606 = vst [vmem:[#allocation2_spill] sm:$0xff] %v2072_v1 }
 0x112   : > { %v2042_v58 = vpop.f32.mrf.mxu0  ;;  %v1630_v0 = vpop.f32.mrf.mxu1 }
 0x113   : > { %v2074_v2 = vadd.f32 %v1630_v0, %v1629_v62 }
 0x114   : > { %v2052_v59 = vpop.f32.mrf.mxu0  ;;  %v1632_v5 = vpop.f32.mrf.mxu1 }
 0x115   : > { %1358 = vrot.lane.b32.xlu1 %v2008_v50, %s1735_s17  ;;  %1232 = vrot.lane.b32.xlu0 %v2018_v53, %s1733_s6  ;;  %2607 = vst [vmem:[#allocation3_spill] sm:$0xff] %v2074_v2 }
 0x116   : > { %v2066_v63 = vpop.f32.mrf.mxu0  ;;  %v1633_v7 = vpop.f32.mrf.mxu1 }
 0x117   : > { %v2114_v9 = vadd.f32 %v1633_v7, %v1632_v5 }
 0x118   : > { %v2084_v3 = vpop.f32.mrf.mxu0  ;;  %v1635_v8 = vpop.f32.mrf.mxu1 }
 0x119   : > { %1234 = vrot.lane.b32.xlu1 %v2024_v55, %s1733_s6  ;;  %1296 = vrot.lane.b32.xlu0 %v2018_v53, %s1734_s16  ;;  %2608 = vst [vmem:[#allocation4_spill] sm:$0xff] %v2114_v9 }
 0x11a   : > { %v2090_v4 = vpop.f32.mrf.mxu0  ;;  %v1636_v10 = vpop.f32.mrf.mxu1 }
 0x11b   : > { %v2120_v11 = vadd.f32 %v1636_v10, %v1635_v8 }
 0x11c   : > { %v2104_v6 = vpop.f32.mrf.mxu0  ;;  %v1638_v24 = vpop.f32.mrf.mxu1 }
 0x11d   : > { %1298 = vrot.lane.b32.xlu1 %v2024_v55, %s1734_s16  ;;  %1360 = vrot.lane.b32.xlu0 %v2018_v53, %s1735_s17  ;;  %2609 = vst [vmem:[#allocation5_spill] sm:$0xff] %v2120_v11 }
 0x11e   : > { %v2128_v13 = vpop.f32.mrf.mxu0  ;;  %v1639_v28 = vpop.f32.mrf.mxu1 }
 0x11f   : > { %v2188_v32 = vadd.f32 %v1639_v28, %v1638_v24 }
 0x120   : > { %v2138_v16 = vpop.f32.mrf.mxu0  ;;  %v1641_v31 = vpop.f32.mrf.mxu1 }
 0x121   : > { %1362 = vrot.lane.b32.xlu1 %v2024_v55, %s1735_s17  ;;  %772 = vrot.lane.b32.xlu0 %v2030_v56, %s1733_s6 }
 0x122   : > { %v2148_v19 = vpop.f32.mrf.mxu0  ;;  %v1642_v36 = vpop.f32.mrf.mxu1 }
 0x123   : > { %v2198_v38 = vadd.f32 %v1642_v36, %v1641_v31 }
 0x124   : > { %v2174_v27 = vpop.f32.mrf.mxu0  ;;  %v1644_v62 = vpop.f32.mrf.mxu1 }
 0x125   : > { %836 = vrot.lane.b32.xlu0 %v2030_v56, %s1734_s16  ;;  %838 = vrot.lane.b32.xlu1 %v2042_v58, %s1734_s16 }
 0x126   : > { %v2204_v41 = vpop.f32.mrf.mxu0  ;;  %v1645_v10 = vpop.f32.mrf.mxu1 }
 0x128   : > { %v2214_v46 = vpop.f32.mrf.mxu0  ;;  %v1647_v36 = vpop.f32.mrf.mxu1 }
 0x129   : > { %900 = vrot.lane.b32.xlu0 %v2030_v56, %s1735_s17  ;;  %902 = vrot.lane.b32.xlu1 %v2042_v58, %s1735_s17 }
 0x12a   : > { %v2224_v51 = vpop.f32.mrf.mxu0 }
 0x12c   : > { %v2244_v7 = vpop.f32.mrf.mxu0 }
 0x12d   : > { %996 = vrot.lane.b32.xlu0 %v2036_v57, %s1733_s6  ;;  %998 = vrot.lane.b32.xlu1 %v2052_v59, %s1733_s6 }
 0x131   : > { %1060 = vrot.lane.b32.xlu0 %v2036_v57, %s1734_s16  ;;  %1062 = vrot.lane.b32.xlu1 %v2052_v59, %s1734_s16 }
 0x135   : > { %1124 = vrot.lane.b32.xlu0 %v2036_v57, %s1735_s17  ;;  %1126 = vrot.lane.b32.xlu1 %v2052_v59, %s1735_s17 }
 0x139   : > { %774 = vrot.lane.b32.xlu0 %v2042_v58, %s1733_s6  ;;  %776 = vrot.lane.b32.xlu1 %v2066_v63, %s1733_s6 }
 0x13d   : > { %1236 = vrot.lane.b32.xlu0 %v2072_v1, %s1733_s6  ;;  %1238 = vrot.lane.b32.xlu1 %v2074_v2, %s1733_s6 }
 0x141   : > { %1300 = vrot.lane.b32.xlu0 %v2072_v1, %s1734_s16  ;;  %1302 = vrot.lane.b32.xlu1 %v2074_v2, %s1734_s16 }
 0x145   : > { %1364 = vrot.lane.b32.xlu0 %v2072_v1, %s1735_s17  ;;  %1366 = vrot.lane.b32.xlu1 %v2074_v2, %s1735_s17  ;;  %v1648_v2 = vpop.f32.mrf.mxu1 }
 0x149   : > { %840 = vrot.lane.b32.xlu0 %v2066_v63, %s1734_s16  ;;  %778 = vrot.lane.b32.xlu1 %v2090_v4, %s1733_s6 }
 0x14d   : > { %904 = vrot.lane.b32.xlu0 %v2066_v63, %s1735_s17  ;;  %842 = vrot.lane.b32.xlu1 %v2090_v4, %s1734_s16 }
 0x151   : > { %1000 = vrot.lane.b32.xlu0 %v2084_v3, %s1733_s6  ;;  %906 = vrot.lane.b32.xlu1 %v2090_v4, %s1735_s17 }
 0x155   : > { %1064 = vrot.lane.b32.xlu0 %v2084_v3, %s1734_s16  ;;  %1002 = vrot.lane.b32.xlu1 %v2104_v6, %s1733_s6 }
 0x159   : > { %1128 = vrot.lane.b32.xlu0 %v2084_v3, %s1735_s17  ;;  %1066 = vrot.lane.b32.xlu1 %v2104_v6, %s1734_s16 }
 0x15d   : > { %1240 = vrot.lane.b32.xlu0 %v2114_v9, %s1733_s6  ;;  %1130 = vrot.lane.b32.xlu1 %v2104_v6, %s1735_s17 }
 0x161   : > { %1304 = vrot.lane.b32.xlu0 %v2114_v9, %s1734_s16  ;;  %1242 = vrot.lane.b32.xlu1 %v2120_v11, %s1733_s6 }
 0x163   : > { %v2126_v12 = vpop.permute.xlu0 %1220 }
 0x165   : > { %1368 = vrot.lane.b32.xlu0 %v2114_v9, %s1735_s17  ;;  %1306 = vrot.lane.b32.xlu1 %v2120_v11, %s1734_s16  ;;  %v2255_v9 = vadd.f32 %v1645_v10, %v1644_v62 }
 0x167   : > { %v2134_v14 = vpop.permute.xlu1 %1222  ;;  %v2136_v15 = vpop.permute.xlu0 %1284 }
 0x169   : > { %1370 = vrot.lane.b32.xlu1 %v2120_v11, %s1735_s17  ;;  %780 = vrot.lane.b32.xlu0 %v2128_v13, %s1733_s6 }
 0x16b   : > { %v2144_v17 = vpop.permute.xlu1 %1286  ;;  %v2146_v18 = vpop.permute.xlu0 %1348 }
 0x16d   : > { %844 = vrot.lane.b32.xlu0 %v2128_v13, %s1734_s16  ;;  %782 = vrot.lane.b32.xlu1 %v2148_v19, %s1733_s6 }
 0x16f   : > { %v2154_v20 = vpop.permute.xlu1 %1350  ;;  %v2156_v21 = vpop.permute.xlu0 %1224 }
 0x171   : > { %908 = vrot.lane.b32.xlu0 %v2128_v13, %s1735_s17  ;;  %846 = vrot.lane.b32.xlu1 %v2148_v19, %s1734_s16 }
 0x173   : > { %v2162_v22 = vpop.permute.xlu1 %1226  ;;  %v2164_v23 = vpop.permute.xlu0 %1288 }
 0x175   : > { %1004 = vrot.lane.b32.xlu0 %v2138_v16, %s1733_s6  ;;  %910 = vrot.lane.b32.xlu1 %v2148_v19, %s1735_s17 }
 0x177   : > { %v2170_v25 = vpop.permute.xlu1 %1290  ;;  %v2172_v26 = vpop.permute.xlu0 %1352 }
 0x179   : > { %1068 = vrot.lane.b32.xlu0 %v2138_v16, %s1734_s16  ;;  %1006 = vrot.lane.b32.xlu1 %v2174_v27, %s1733_s6 }
 0x17b   : > { %v2180_v29 = vpop.permute.xlu1 %1354  ;;  %v2182_v30 = vpop.permute.xlu0 %1228 }
 0x17d   : > { %1132 = vrot.lane.b32.xlu0 %v2138_v16, %s1735_s17  ;;  %1070 = vrot.lane.b32.xlu1 %v2174_v27, %s1734_s16 }
 0x17f   : > { %v2190_v33 = vpop.permute.xlu1 %1230  ;;  %v2192_v35 = vpop.permute.xlu0 %1292 }
 0x181   : > { %1244 = vrot.lane.b32.xlu0 %v2188_v32, %s1733_s6  ;;  %1134 = vrot.lane.b32.xlu1 %v2174_v27, %s1735_s17 }
 0x183   : > { %v2200_v39 = vpop.permute.xlu1 %1294  ;;  %v2202_v40 = vpop.permute.xlu0 %1356 }
 0x185   : > { %1308 = vrot.lane.b32.xlu0 %v2188_v32, %s1734_s16  ;;  %1246 = vrot.lane.b32.xlu1 %v2198_v38, %s1733_s6 }
 0x187   : > { %v2210_v43 = vpop.permute.xlu1 %1358  ;;  %v2212_v44 = vpop.permute.xlu0 %1232 }
 0x189   : > { %1310 = vrot.lane.b32.xlu1 %v2198_v38, %s1734_s16  ;;  %784 = vrot.lane.b32.xlu0 %v2204_v41, %s1733_s6 }
 0x18b   : > { %v2220_v47 = vpop.permute.xlu1 %1234  ;;  %v2222_v49 = vpop.permute.xlu0 %1296 }
 0x18c   : > { %2610 = vst [vmem:[#allocation6_spill] sm:$0xff] %v2220_v47 }
 0x18d   : > { %848 = vrot.lane.b32.xlu0 %v2204_v41, %s1734_s16  ;;  %786 = vrot.lane.b32.xlu1 %v2224_v51, %s1733_s6 }
 0x18f   : > { %v2230_v52 = vpop.permute.xlu1 %1298  ;;  %v2232_v54 = vpop.permute.xlu0 %1360 }
 0x190   : > { %2611 = vst [vmem:[#allocation7_spill] sm:$0xff] %v2230_v52 }
 0x191   : > { %912 = vrot.lane.b32.xlu0 %v2204_v41, %s1735_s17  ;;  %850 = vrot.lane.b32.xlu1 %v2224_v51, %s1734_s16 }
 0x193   : > { %v2238_v60 = vpop.permute.xlu1 %1362  ;;  %v773_v61 = vpop.permute.xlu0 %772 }
 0x194   : > { %2612 = vst [vmem:[#allocation8_spill] sm:$0xff] %v2238_v60  ;;  %v820_v8 = vmax.f32 %v2030_v56, %v773_v61  ;;  %v2264_v60 = vpop.f32.mrf.mxu0 }
 0x195   : > { %1008 = vrot.lane.b32.xlu0 %v2214_v46, %s1733_s6  ;;  %914 = vrot.lane.b32.xlu1 %v2224_v51, %s1735_s17 }
 0x196   : > { %v2270_v10 = vpop.f32.mrf.mxu0 }
 0x197   : > { %v837_v0 = vpop.permute.xlu0 %836  ;;  %v839_v5 = vpop.permute.xlu1 %838 }
 0x198   : > { %v884_v24 = vmax.f32 %v820_v8, %v837_v0  ;;  %v2262_v0 = vadd.f32 %v1648_v2, %v1647_v36 }
 0x199   : > { %1072 = vrot.lane.b32.xlu0 %v2214_v46, %s1734_s16  ;;  %1010 = vrot.lane.b32.xlu1 %v2244_v7, %s1733_s6 }
 0x19b   : > { %v901_v28 = vpop.permute.xlu0 %900  ;;  %v903_v31 = vpop.permute.xlu1 %902 }
 0x19c   : > { %v948_v11 = vmax.f32 %v884_v24, %v901_v28 }
 0x19d   : > { %1136 = vrot.lane.b32.xlu0 %v2214_v46, %s1735_s17  ;;  %1074 = vrot.lane.b32.xlu1 %v2244_v7, %s1734_s16 }
 0x19e   : > { %v964_v1 = vmax.f32 %v948_v11, %v2036_v57 }
 0x19f   : > { %v997_v56 = vpop.permute.xlu0 %996  ;;  %v999_v61 = vpop.permute.xlu1 %998 }
 0x1a0   : > { %v1044_v28 = vmax.f32 %v964_v1, %v997_v56  ;;  %v2277_v56 = vpop.f32.mrf.mxu0 }
 0x1a1   : > { %1248 = vrot.lane.b32.xlu0 %v2255_v9, %s1733_s6  ;;  %1138 = vrot.lane.b32.xlu1 %v2244_v7, %s1735_s17 }
 0x1a3   : > { %v1061_v8 = vpop.permute.xlu0 %1060  ;;  %v1063_v24 = vpop.permute.xlu1 %1062 }
 0x1a4   : > { %v1108_v57 = vmax.f32 %v1044_v28, %v1061_v8 }
 0x1a5   : > { %1312 = vrot.lane.b32.xlu0 %v2255_v9, %s1734_s16  ;;  %1250 = vrot.lane.b32.xlu1 %v2262_v0, %s1733_s6 }
 0x1a7   : > { %v1125_v11 = vpop.permute.xlu0 %1124  ;;  %v1127_v62 = vpop.permute.xlu1 %1126 }
 0x1a8   : > { %v1172_v52 = vmax.f32 %v1108_v57, %v1125_v11 }
 0x1a9   : > { %1314 = vrot.lane.b32.xlu1 %v2262_v0, %s1734_s16  ;;  %788 = vrot.lane.b32.xlu0 %v2264_v60, %s1733_s6 }
 0x1aa   : > { %v1188_v1 = vmax.f32 %v1172_v52, %v1972_v34  ;;  %v2289_v34 = vld [vmem:[%s2600_s2] ss:$0 sm:$0xff] }
 0x1ab   : > { %v775_v2 = vpop.permute.xlu0 %774  ;;  %v777_v36 = vpop.permute.xlu1 %776 }
 0x1ac   : > { %v1268_v8 = vmax.f32 %v1188_v1, %v2126_v12  ;;  %v821_v28 = vmax.f32 %v2042_v58, %v775_v2 }
 0x1ad   : > { %852 = vrot.lane.b32.xlu0 %v2264_v60, %s1734_s16  ;;  %790 = vrot.lane.b32.xlu1 %v2277_v56, %s1733_s6 }
 0x1ae   : > { %v1332_v57 = vmax.f32 %v1268_v8, %v2136_v15  ;;  %v885_v11 = vmax.f32 %v821_v28, %v839_v5 }
 0x1af   : > { %v2291_v52 = vpop.permute.xlu0 %1236  ;;  %v2293_v47 = vpop.permute.xlu1 %1238 }
 0x1b0   : > { %v1396_v58 = vmax.f32 %v1332_v57, %v2146_v18  ;;  %v949_v12 = vmax.f32 %v885_v11, %v903_v31  ;;  %v2322_v57 = vpop.f32.mrf.mxu0 }
 0x1b1   : > { %916 = vrot.lane.b32.xlu0 %v2264_v60, %s1735_s17  ;;  %854 = vrot.lane.b32.xlu1 %v2277_v56, %s1734_s16 }
 0x1b2   : > { %v1419_v15 = vadd.f32 %v2289_v34, %v1396_v58  ;;  %v965_v5 = vmax.f32 %v949_v12, %v2052_v59 }
 0x1b3   : > { %v2308_v1 = vpop.permute.xlu0 %1300  ;;  %v2310_v18 = vpop.permute.xlu1 %1302 }
 0x1b4   : > { %v1435_v31 = vmax.f32 %v1419_v15, 0.0  ;;  %v1045_v2 = vmax.f32 %v965_v5, %v999_v61  ;;  %v2331_v5 = vpop.f32.mrf.mxu0 }
 0x1b5   : > { %1012 = vrot.lane.b32.xlu0 %v2270_v10, %s1733_s6  ;;  %918 = vrot.lane.b32.xlu1 %v2277_v56, %s1735_s17 }
 0x1b6   : > { %1452 = vst.msk [vmem:[%s2306_s23] sm:$0xff] %vm1451_vm0, %v1435_v31  ;;  %v1109_v59 = vmax.f32 %v1045_v2, %v1063_v24  ;;  %v822_v24 = vmax.f32 %v2066_v63, %v777_v36 }
 0x1b7   : > { %v2318_v8 = vpop.permute.xlu0 %1364  ;;  %v2320_v28 = vpop.permute.xlu1 %1366 }
 0x1b8   : > { %v1173_v11 = vmax.f32 %v1109_v59, %v1127_v62 }
 0x1b9   : > { %1076 = vrot.lane.b32.xlu0 %v2270_v10, %s1734_s16  ;;  %1014 = vrot.lane.b32.xlu1 %v2322_v57, %s1733_s6 }
 0x1ba   : > { %v1189_v61 = vmax.f32 %v1173_v11, %v1976_v37  ;;  %v2340_v11 = vpop.f32.mrf.mxu0 }
 0x1bb   : > { %v841_v58 = vpop.permute.xlu0 %840  ;;  %v779_v12 = vpop.permute.xlu1 %778 }
 0x1bc   : > { %v1269_v15 = vmax.f32 %v1189_v61, %v2134_v14  ;;  %v886_v31 = vmax.f32 %v822_v24, %v841_v58  ;;  %v823_v14 = vmax.f32 %v2090_v4, %v779_v12  ;;  %v2347_v24 = vpop.f32.mrf.mxu0 }
 0x1bd   : > { %1140 = vrot.lane.b32.xlu0 %v2270_v10, %s1735_s17  ;;  %1078 = vrot.lane.b32.xlu1 %v2322_v57, %s1734_s16 }
 0x1be   : > { %v1333_v62 = vmax.f32 %v1269_v15, %v2144_v17 }
 0x1bf   : > { %v905_v2 = vpop.permute.xlu0 %904  ;;  %v843_v59 = vpop.permute.xlu1 %842 }
 0x1c0   : > { %v1397_v37 = vmax.f32 %v1333_v62, %v2154_v20  ;;  %v950_v63 = vmax.f32 %v886_v31, %v905_v2  ;;  %v887_v17 = vmax.f32 %v823_v14, %v843_v59 }
 0x1c1   : > { %1142 = vrot.lane.b32.xlu1 %v2322_v57, %s1735_s17  ;;  %792 = vrot.lane.b32.xlu0 %v2331_v5, %s1733_s6 }
 0x1c2   : > { %v1420_v36 = vadd.f32 %v2289_v34, %v1397_v37  ;;  %v966_v20 = vmax.f32 %v950_v63, %v2084_v3 }
 0x1c3   : > { %v1001_v61 = vpop.permute.xlu0 %1000  ;;  %v907_v58 = vpop.permute.xlu1 %906 }
 0x1c4   : > { %v1436_v15 = vmax.f32 %v1420_v36, 0.0  ;;  %v951_v4 = vmax.f32 %v887_v17, %v907_v58  ;;  %v1046_v31 = vmax.f32 %v966_v20, %v1001_v61  ;;  %v2368_v58 = vpop.f32.mrf.mxu0 }
 0x1c5   : > { %856 = vrot.lane.b32.xlu0 %v2331_v5, %s1734_s16  ;;  %794 = vrot.lane.b32.xlu1 %v2347_v24, %s1733_s6 }
 0x1c6   : > { %1453 = vst.msk [vmem:[%s2306_s23 + $0x8] sm:$0xff] %vm1451_vm0, %v1436_v15  ;;  %v967_v2 = vmax.f32 %v951_v4, %v2104_v6 }
 0x1c7   : > { %v1065_v12 = vpop.permute.xlu0 %1064  ;;  %v1003_v62 = vpop.permute.xlu1 %1002 }
 0x1c8   : > { %v1110_v3 = vmax.f32 %v1046_v31, %v1065_v12  ;;  %v1047_v14 = vmax.f32 %v967_v2, %v1003_v62  ;;  %v2383_v2 = vpop.f32.mrf.mxu0 }
 0x1c9   : > { %920 = vrot.lane.b32.xlu0 %v2331_v5, %s1735_s17  ;;  %858 = vrot.lane.b32.xlu1 %v2347_v24, %s1734_s16 }
 0x1cb   : > { %v1129_v59 = vpop.permute.xlu0 %1128  ;;  %v1067_v37 = vpop.permute.xlu1 %1066 }
 0x1cc   : > { %v1174_v63 = vmax.f32 %v1110_v3, %v1129_v59  ;;  %v1111_v6 = vmax.f32 %v1047_v14, %v1067_v37  ;;  %v2396_v37 = vpop.f32.mrf.mxu0 }
 0x1cd   : > { %1016 = vrot.lane.b32.xlu0 %v2340_v11, %s1733_s6  ;;  %922 = vrot.lane.b32.xlu1 %v2347_v24, %s1735_s17 }
 0x1ce   : > { %v1190_v36 = vmax.f32 %v1174_v63, %v1986_v42 }
 0x1cf   : > { %v2366_v17 = vpop.permute.xlu0 %1240  ;;  %v1131_v61 = vpop.permute.xlu1 %1130 }
 0x1d0   : > { %v1270_v15 = vmax.f32 %v1190_v36, %v2156_v21  ;;  %v1175_v20 = vmax.f32 %v1111_v6, %v1131_v61  ;;  %v2407_v6 = vpop.f32.mrf.mxu0 }
 0x1d1   : > { %1080 = vrot.lane.b32.xlu0 %v2340_v11, %s1734_s16  ;;  %1018 = vrot.lane.b32.xlu1 %v2368_v58, %s1733_s6 }
 0x1d2   : > { %v1334_v4 = vmax.f32 %v1270_v15, %v2164_v23  ;;  %v1191_v12 = vmax.f32 %v1175_v20, %v1992_v45 }
 0x1d3   : > { %v2377_v42 = vpop.permute.xlu0 %1304  ;;  %v2379_v62 = vpop.permute.xlu1 %1242 }
 0x1d4   : > { %v1398_v31 = vmax.f32 %v1334_v4, %v2172_v26  ;;  %v1271_v21 = vmax.f32 %v1191_v12, %v2162_v22 }
 0x1d5   : > { %1144 = vrot.lane.b32.xlu0 %v2340_v11, %s1735_s17  ;;  %1082 = vrot.lane.b32.xlu1 %v2368_v58, %s1734_s16 }
 0x1d6   : > { %v1421_v23 = vadd.f32 %v2289_v34, %v1398_v31  ;;  %v1335_v45 = vmax.f32 %v1271_v21, %v2170_v25 }
 0x1d7   : > { %v2391_v3 = vpop.permute.xlu0 %1368  ;;  %v2393_v59 = vpop.permute.xlu1 %1306 }
 0x1d8   : > { %v1437_v26 = vmax.f32 %v1421_v23, 0.0  ;;  %v1399_v22 = vmax.f32 %v1335_v45, %v2180_v29 }
 0x1d9   : > { %1146 = vrot.lane.b32.xlu1 %v2368_v58, %s1735_s17  ;;  %796 = vrot.lane.b32.xlu0 %v2383_v2, %s1733_s6 }
 0x1da   : > { %1454 = vst.msk [vmem:[%s2306_s23 + $0x10] sm:$0xff] %vm1451_vm0, %v1437_v26  ;;  %v1422_v25 = vadd.f32 %v2289_v34, %v1399_v22  ;;  %v2425_v26 = vpop.f32.mrf.mxu0 }
 0x1db   : > { %v2405_v14 = vpop.permute.xlu1 %1370  ;;  %v781_v63 = vpop.permute.xlu0 %780 }
 0x1dc   : > { %v1438_v36 = vmax.f32 %v1422_v25, 0.0  ;;  %v824_v15 = vmax.f32 %v2128_v13, %v781_v63 }
 0x1dd   : > { %860 = vrot.lane.b32.xlu0 %v2383_v2, %s1734_s16  ;;  %798 = vrot.lane.b32.xlu1 %v2407_v6, %s1733_s6 }
 0x1de   : > { %1455 = vst.msk [vmem:[%s2306_s23 + $0x18] sm:$0xff] %vm1451_vm0, %v1438_v36 }
 0x1df   : > { %v845_v29 = vpop.permute.xlu0 %844  ;;  %v783_v61 = vpop.permute.xlu1 %782 }
 0x1e0   : > { %v888_v20 = vmax.f32 %v824_v15, %v845_v29  ;;  %v825_v31 = vmax.f32 %v2148_v19, %v783_v61  ;;  %v2432_v29 = vpop.f32.mrf.mxu0 }
 0x1e1   : > { %924 = vrot.lane.b32.xlu0 %v2383_v2, %s1735_s17  ;;  %862 = vrot.lane.b32.xlu1 %v2407_v6, %s1734_s16 }
 0x1e3   : > { %v909_v4 = vpop.permute.xlu0 %908  ;;  %v847_v12 = vpop.permute.xlu1 %846 }
 0x1e4   : > { %v952_v21 = vmax.f32 %v888_v20, %v909_v4  ;;  %v889_v23 = vmax.f32 %v825_v31, %v847_v12  ;;  %v2439_v12 = vpop.f32.mrf.mxu0 }
 0x1e5   : > { %1020 = vrot.lane.b32.xlu0 %v2396_v37, %s1733_s6  ;;  %926 = vrot.lane.b32.xlu1 %v2407_v6, %s1735_s17 }
 0x1e6   : > { %v968_v22 = vmax.f32 %v952_v21, %v2138_v16 }
 0x1e7   : > { %v1005_v13 = vpop.permute.xlu0 %1004  ;;  %v911_v45 = vpop.permute.xlu1 %910 }
 0x1e8   : > { %v953_v25 = vmax.f32 %v889_v23, %v911_v45  ;;  %v1048_v36 = vmax.f32 %v968_v22, %v1005_v13  ;;  %v2448_v45 = vpop.f32.mrf.mxu0 }
 0x1e9   : > { %1084 = vrot.lane.b32.xlu0 %v2396_v37, %s1734_s16  ;;  %1022 = vrot.lane.b32.xlu1 %v2425_v26, %s1733_s6 }
 0x1ea   : > { %v969_v61 = vmax.f32 %v953_v25, %v2174_v27 }
 0x1eb   : > { %v1069_v19 = vpop.permute.xlu0 %1068  ;;  %v1007_v63 = vpop.permute.xlu1 %1006 }
 0x1ec   : > { %v1112_v16 = vmax.f32 %v1048_v36, %v1069_v19  ;;  %v1049_v4 = vmax.f32 %v969_v61, %v1007_v63 }
 0x1ed   : > { %1148 = vrot.lane.b32.xlu0 %v2396_v37, %s1735_s17  ;;  %1086 = vrot.lane.b32.xlu1 %v2425_v26, %s1734_s16 }
 0x1ef   : > { %v1133_v15 = vpop.permute.xlu0 %1132  ;;  %v1071_v20 = vpop.permute.xlu1 %1070 }
 0x1f0   : > { %v1176_v31 = vmax.f32 %v1112_v16, %v1133_v15  ;;  %v1113_v21 = vmax.f32 %v1049_v4, %v1071_v20 }
 0x1f1   : > { %1150 = vrot.lane.b32.xlu1 %v2425_v26, %s1735_s17  ;;  %800 = vrot.lane.b32.xlu0 %v2432_v29, %s1733_s6 }
 0x1f2   : > { %v1192_v27 = vmax.f32 %v1176_v31, %v2002_v48 }
 0x1f3   : > { %v2446_v23 = vpop.permute.xlu0 %1244  ;;  %v1135_v13 = vpop.permute.xlu1 %1134 }
 0x1f4   : > { %v1272_v22 = vmax.f32 %v1192_v27, %v2182_v30  ;;  %v1177_v25 = vmax.f32 %v1113_v21, %v1135_v13 }
 0x1f5   : > { %864 = vrot.lane.b32.xlu0 %v2432_v29, %s1734_s16  ;;  %802 = vrot.lane.b32.xlu1 %v2448_v45, %s1733_s6 }
 0x1f6   : > { %v1336_v19 = vmax.f32 %v1272_v22, %v2192_v35  ;;  %v1193_v48 = vmax.f32 %v1177_v25, %v2008_v50 }
 0x1f7   : > { %v2457_v63 = vpop.permute.xlu0 %1308  ;;  %v2459_v36 = vpop.permute.xlu1 %1246 }
 0x1f8   : > { %v1400_v61 = vmax.f32 %v1336_v19, %v2202_v40  ;;  %v1273_v30 = vmax.f32 %v1193_v48, %v2190_v33 }
 0x1f9   : > { %928 = vrot.lane.b32.xlu0 %v2432_v29, %s1735_s17  ;;  %866 = vrot.lane.b32.xlu1 %v2448_v45, %s1734_s16 }
 0x1fa   : > { %v1423_v16 = vadd.f32 %v2289_v34, %v1400_v61  ;;  %v1337_v35 = vmax.f32 %v1273_v30, %v2200_v39  ;;  %v2479_v39 = vpop.f32.mrf.mxu0 }
 0x1fb   : > { %v2469_v50 = vpop.permute.xlu1 %1310  ;;  %v785_v15 = vpop.permute.xlu0 %784 }
 0x1fc   : > { %v1439_v20 = vmax.f32 %v1423_v16, 0.0  ;;  %v1401_v4 = vmax.f32 %v1337_v35, %v2210_v43  ;;  %v826_v21 = vmax.f32 %v2204_v41, %v785_v15 }
 0x1fd   : > { %1024 = vrot.lane.b32.xlu0 %v2439_v12, %s1733_s6  ;;  %930 = vrot.lane.b32.xlu1 %v2448_v45, %s1735_s17 }
 0x1fe   : > { %1456 = vst.msk [vmem:[%s2306_s23 + $0x20] sm:$0xff] %vm1451_vm0, %v1439_v20  ;;  %v1424_v33 = vadd.f32 %v2289_v34, %v1401_v4 }
 0x1ff   : > { %v849_v40 = vpop.permute.xlu0 %848  ;;  %v787_v31 = vpop.permute.xlu1 %786 }
 0x200   : > { %v1440_v27 = vmax.f32 %v1424_v33, 0.0  ;;  %v890_v43 = vmax.f32 %v826_v21, %v849_v40  ;;  %v827_v25 = vmax.f32 %v2224_v51, %v787_v31 }
 0x201   : > { %1088 = vrot.lane.b32.xlu0 %v2439_v12, %s1734_s16  ;;  %1026 = vrot.lane.b32.xlu1 %v2479_v39, %s1733_s6 }
 0x202   : > { %1457 = vst.msk [vmem:[%s2306_s23 + $0x28] sm:$0xff] %vm1451_vm0, %v1440_v27 }
 0x203   : > { %v913_v13 = vpop.permute.xlu0 %912  ;;  %v851_v22 = vpop.permute.xlu1 %850 }
 0x204   : > { %v954_v19 = vmax.f32 %v890_v43, %v913_v13  ;;  %v891_v41 = vmax.f32 %v827_v25, %v851_v22 }
 0x205   : > { %1152 = vrot.lane.b32.xlu0 %v2439_v12, %s1735_s17  ;;  %1090 = vrot.lane.b32.xlu1 %v2479_v39, %s1734_s16 }
 0x206   : > { %v970_v30 = vmax.f32 %v954_v19, %v2214_v46 }
 0x207   : > { %v1009_v48 = vpop.permute.xlu0 %1008  ;;  %v915_v61 = vpop.permute.xlu1 %914 }
 0x208   : > { %v955_v16 = vmax.f32 %v891_v41, %v915_v61  ;;  %v1050_v15 = vmax.f32 %v970_v30, %v1009_v48 }
 0x209   : > { %1372 = vrot.lane.b32.xlu0 %v2188_v32, %s1735_s17  ;;  %1154 = vrot.lane.b32.xlu1 %v2479_v39, %s1735_s17 }
 0x20a   : > { %v971_v20 = vmax.f32 %v955_v16, %v2244_v7 }
 0x20b   : > { %v1073_v51 = vpop.permute.xlu0 %1072  ;;  %v1011_v35 = vpop.permute.xlu1 %1010 }
 0x20c   : > { %v1114_v4 = vmax.f32 %v1050_v15, %v1073_v51  ;;  %v1051_v40 = vmax.f32 %v971_v20, %v1011_v35  ;;  %v2614_v51 = vld [vmem:[#allocation7_spill] sm:$0xff] }
 0x20d   : > { %1376 = vrot.lane.b32.xlu0 %v2255_v9, %s1735_s17  ;;  %1374 = vrot.lane.b32.xlu1 %v2198_v38, %s1735_s17 }
 0x20f   : > { %v1137_v46 = vpop.permute.xlu0 %1136  ;;  %v1075_v33 = vpop.permute.xlu1 %1074 }
 0x210   : > { %v1178_v31 = vmax.f32 %v1114_v4, %v1137_v46  ;;  %v1115_v21 = vmax.f32 %v1051_v40, %v1075_v33 }
 0x211   : > { %1378 = vrot.lane.b32.xlu1 %v2262_v0, %s1735_s17 }
 0x212   : > { %v1194_v27 = vmax.f32 %v1178_v31, %v2018_v53  ;;  %v2613_v53 = vld [vmem:[#allocation6_spill] sm:$0xff] }
 0x213   : > { %v2506_v43 = vpop.permute.xlu0 %1248  ;;  %v1139_v7 = vpop.permute.xlu1 %1138 }
 0x214   : > { %v1274_v13 = vmax.f32 %v1194_v27, %v2212_v44  ;;  %v1179_v22 = vmax.f32 %v1115_v21, %v1139_v7 }
 0x216   : > { %v1338_v25 = vmax.f32 %v1274_v13, %v2222_v49  ;;  %v1195_v19 = vmax.f32 %v1179_v22, %v2024_v55  ;;  %v2615_v49 = vld [vmem:[#allocation8_spill] sm:$0xff] }
 0x217   : > { %v2511_v41 = vpop.permute.xlu0 %1312  ;;  %v2513_v48 = vpop.permute.xlu1 %1250 }
 0x218   : > { %v1402_v61 = vmax.f32 %v1338_v25, %v2232_v54  ;;  %v1275_v30 = vmax.f32 %v1195_v19, %v2613_v53 }
 0x21a   : > { %v1425_v16 = vadd.f32 %v2289_v34, %v1402_v61  ;;  %v1339_v35 = vmax.f32 %v1275_v30, %v2614_v51 }
 0x21b   : > { %v2519_v15 = vpop.permute.xlu1 %1314  ;;  %v789_v44 = vpop.permute.xlu0 %788 }
 0x21c   : > { %v1441_v20 = vmax.f32 %v1425_v16, 0.0  ;;  %v1403_v4 = vmax.f32 %v1339_v35, %v2615_v49  ;;  %v828_v54 = vmax.f32 %v2264_v60, %v789_v44 }
 0x21e   : > { %1458 = vst.msk [vmem:[%s2306_s23 + $0x30] sm:$0xff] %vm1451_vm0, %v1441_v20  ;;  %v1426_v55 = vadd.f32 %v2289_v34, %v1403_v4 }
 0x21f   : > { %v853_v46 = vpop.permute.xlu0 %852  ;;  %v791_v33 = vpop.permute.xlu1 %790 }
 0x220   : > { %v1442_v40 = vmax.f32 %v1426_v55, 0.0  ;;  %v892_v31 = vmax.f32 %v828_v54, %v853_v46  ;;  %v829_v7 = vmax.f32 %v2277_v56, %v791_v33  ;;  %v2616_v55 = vld [vmem:[#allocation2_spill] sm:$0xff] }
 0x222   : > { %1459 = vst.msk [vmem:[%s2306_s23 + $0x38] sm:$0xff] %vm1451_vm0, %v1442_v40 }
 0x223   : > { %v917_v27 = vpop.permute.xlu0 %916  ;;  %v855_v21 = vpop.permute.xlu1 %854 }
 0x224   : > { %v956_v13 = vmax.f32 %v892_v31, %v917_v27  ;;  %v893_v22 = vmax.f32 %v829_v7, %v855_v21  ;;  %v2617_v27 = vld [vmem:[#allocation3_spill] sm:$0xff] }
 0x226   : > { %v972_v61 = vmax.f32 %v956_v13, %v2270_v10 }
 0x227   : > { %v1013_v25 = vpop.permute.xlu0 %1012  ;;  %v919_v19 = vpop.permute.xlu1 %918 }
 0x228   : > { %v957_v53 = vmax.f32 %v893_v22, %v919_v19  ;;  %v1052_v51 = vmax.f32 %v972_v61, %v1013_v25 }
 0x22a   : > { %v973_v35 = vmax.f32 %v957_v53, %v2322_v57 }
 0x22b   : > { %v1077_v30 = vpop.permute.xlu0 %1076  ;;  %v1015_v16 = vpop.permute.xlu1 %1014 }
 0x22c   : > { %v1116_v60 = vmax.f32 %v1052_v51, %v1077_v30  ;;  %v1053_v49 = vmax.f32 %v973_v35, %v1015_v16 }
 0x22f   : > { %v1141_v44 = vpop.permute.xlu0 %1140  ;;  %v1079_v20 = vpop.permute.xlu1 %1078 }
 0x230   : > { %v1180_v4 = vmax.f32 %v1116_v60, %v1141_v44  ;;  %v1117_v56 = vmax.f32 %v1053_v49, %v1079_v20 }
 0x232   : > { %v1196_v46 = vmax.f32 %v1180_v4, %v2616_v55 }
 0x233   : > { %v1143_v33 = vpop.permute.xlu1 %1142  ;;  %v793_v40 = vpop.permute.xlu0 %792 }
 0x234   : > { %v1276_v54 = vmax.f32 %v1196_v46, %v2291_v52  ;;  %v1181_v31 = vmax.f32 %v1117_v56, %v1143_v33  ;;  %v830_v25 = vmax.f32 %v2331_v5, %v793_v40 }
 0x236   : > { %v1340_v10 = vmax.f32 %v1276_v54, %v2308_v1  ;;  %v1197_v21 = vmax.f32 %v1181_v31, %v2617_v27  ;;  %v2618_v54 = vld [vmem:[#allocation4_spill] sm:$0xff] }
 0x237   : > { %v857_v7 = vpop.permute.xlu0 %856  ;;  %v795_v57 = vpop.permute.xlu1 %794 }
 0x238   : > { %v1404_v13 = vmax.f32 %v1340_v10, %v2318_v8  ;;  %v1277_v22 = vmax.f32 %v1197_v21, %v2293_v47  ;;  %v894_v52 = vmax.f32 %v830_v25, %v857_v7  ;;  %v831_v51 = vmax.f32 %v2347_v24, %v795_v57 }
 0x23a   : > { %v1427_v19 = vadd.f32 %v2289_v34, %v1404_v13  ;;  %v1341_v61 = vmax.f32 %v1277_v22, %v2310_v18  ;;  %v2619_v13 = vld [vmem:[#allocation5_spill] sm:$0xff] }
 0x23b   : > { %v921_v53 = vpop.permute.xlu0 %920  ;;  %v859_v30 = vpop.permute.xlu1 %858 }
 0x23c   : > { %v1443_v1 = vmax.f32 %v1427_v19, 0.0  ;;  %v1405_v16 = vmax.f32 %v1341_v61, %v2320_v28  ;;  %v958_v35 = vmax.f32 %v894_v52, %v921_v53  ;;  %v895_v8 = vmax.f32 %v831_v51, %v859_v30 }
 0x23e   : > { %1460 = vst.msk [vmem:[%s2306_s23 + $0x40] sm:$0xff] %vm1451_vm0, %v1443_v1  ;;  %v1428_v47 = vadd.f32 %v2289_v34, %v1405_v16  ;;  %v974_v18 = vmax.f32 %v958_v35, %v2340_v11 }
 0x23f   : > { %v1017_v5 = vpop.permute.xlu0 %1016  ;;  %v923_v60 = vpop.permute.xlu1 %922 }
 0x240   : > { %v1444_v44 = vmax.f32 %v1428_v47, 0.0  ;;  %v959_v20 = vmax.f32 %v895_v8, %v923_v60  ;;  %v1054_v55 = vmax.f32 %v974_v18, %v1017_v5 }
 0x242   : > { %1461 = vst.msk [vmem:[%s2306_s23 + $0x48] sm:$0xff] %vm1451_vm0, %v1444_v44  ;;  %v975_v28 = vmax.f32 %v959_v20, %v2368_v58 }
 0x243   : > { %v1081_v49 = vpop.permute.xlu0 %1080  ;;  %v1019_v4 = vpop.permute.xlu1 %1018 }
 0x244   : > { %v1118_v24 = vmax.f32 %v1054_v55, %v1081_v49  ;;  %v1055_v33 = vmax.f32 %v975_v28, %v1019_v4 }
 0x247   : > { %v1145_v46 = vpop.permute.xlu0 %1144  ;;  %v1083_v56 = vpop.permute.xlu1 %1082 }
 0x248   : > { %v1182_v40 = vmax.f32 %v1118_v24, %v1145_v46  ;;  %v1119_v10 = vmax.f32 %v1055_v33, %v1083_v56 }
 0x24a   : > { %v1198_v31 = vmax.f32 %v1182_v40, %v2618_v54 }
 0x24b   : > { %v1147_v27 = vpop.permute.xlu1 %1146  ;;  %v797_v21 = vpop.permute.xlu0 %796 }
 0x24c   : > { %v1278_v11 = vmax.f32 %v1198_v31, %v2366_v17  ;;  %v1183_v7 = vmax.f32 %v1119_v10, %v1147_v27  ;;  %v832_v8 = vmax.f32 %v2383_v2, %v797_v21 }
 0x24e   : > { %v1342_v57 = vmax.f32 %v1278_v11, %v2377_v42  ;;  %v1199_v22 = vmax.f32 %v1183_v7, %v2619_v13 }
 0x24f   : > { %v861_v58 = vpop.permute.xlu0 %860  ;;  %v799_v25 = vpop.permute.xlu1 %798 }
 0x250   : > { %v1406_v19 = vmax.f32 %v1342_v57, %v2391_v3  ;;  %v1279_v61 = vmax.f32 %v1199_v22, %v2379_v62  ;;  %v896_v60 = vmax.f32 %v832_v8, %v861_v58  ;;  %v833_v44 = vmax.f32 %v2407_v6, %v799_v25 }
 0x252   : > { %v1429_v52 = vadd.f32 %v2289_v34, %v1406_v19  ;;  %v1343_v53 = vmax.f32 %v1279_v61, %v2393_v59 }
 0x253   : > { %v925_v30 = vpop.permute.xlu0 %924  ;;  %v863_v1 = vpop.permute.xlu1 %862 }
 0x254   : > { %v1445_v16 = vmax.f32 %v1429_v52, 0.0  ;;  %v1407_v17 = vmax.f32 %v1343_v53, %v2405_v14  ;;  %v960_v18 = vmax.f32 %v896_v60, %v925_v30  ;;  %v897_v49 = vmax.f32 %v833_v44, %v863_v1 }
 0x256   : > { %1462 = vst.msk [vmem:[%s2306_s23 + $0x50] sm:$0xff] %vm1451_vm0, %v1445_v16  ;;  %v1430_v42 = vadd.f32 %v2289_v34, %v1407_v17  ;;  %v976_v4 = vmax.f32 %v960_v18, %v2396_v37 }
 0x257   : > { %v1021_v51 = vpop.permute.xlu0 %1020  ;;  %v927_v35 = vpop.permute.xlu1 %926 }
 0x258   : > { %v1446_v47 = vmax.f32 %v1430_v42, 0.0  ;;  %v961_v55 = vmax.f32 %v897_v49, %v927_v35  ;;  %v1056_v56 = vmax.f32 %v976_v4, %v1021_v51 }
 0x25a   : > { %1463 = vst.msk [vmem:[%s2306_s23 + $0x58] sm:$0xff] %vm1451_vm0, %v1446_v47  ;;  %v977_v33 = vmax.f32 %v961_v55, %v2425_v26 }
 0x25b   : > { %v1085_v3 = vpop.permute.xlu0 %1084  ;;  %v1023_v62 = vpop.permute.xlu1 %1022 }
 0x25c   : > { %v1120_v31 = vmax.f32 %v1056_v56, %v1085_v3  ;;  %v1057_v27 = vmax.f32 %v977_v33, %v1023_v62 }
 0x25f   : > { %v1149_v5 = vpop.permute.xlu0 %1148  ;;  %v1087_v59 = vpop.permute.xlu1 %1086 }
 0x260   : > { %v1184_v21 = vmax.f32 %v1120_v31, %v1149_v5  ;;  %v1121_v57 = vmax.f32 %v1057_v27, %v1087_v59 }
 0x263   : > { %v1151_v14 = vpop.permute.xlu1 %1150  ;;  %v801_v20 = vpop.permute.xlu0 %800 }
 0x264   : > { %v834_v46 = vmax.f32 %v2432_v29, %v801_v20  ;;  %v1200_v29 = vmax.f32 %v1184_v21, %v2188_v32  ;;  %v1185_v58 = vmax.f32 %v1121_v57, %v1151_v14 }
 0x266   : > { %v1280_v53 = vmax.f32 %v1200_v29, %v2446_v23 }
 0x267   : > { %v865_v28 = vpop.permute.xlu0 %864  ;;  %v803_v24 = vpop.permute.xlu1 %802 }
 0x268   : > { %v898_v2 = vmax.f32 %v834_v46, %v865_v28  ;;  %v835_v6 = vmax.f32 %v2448_v45, %v803_v24  ;;  %v1201_v45 = vmax.f32 %v1185_v58, %v2198_v38  ;;  %v1344_v32 = vmax.f32 %v1280_v53, %v2457_v63 }
 0x26a   : > { %v1281_v51 = vmax.f32 %v1201_v45, %v2459_v36 }
 0x26b   : > { %v929_v40 = vpop.permute.xlu0 %928  ;;  %v867_v54 = vpop.permute.xlu1 %866 }
 0x26c   : > { %v962_v10 = vmax.f32 %v898_v2, %v929_v40  ;;  %v899_v11 = vmax.f32 %v835_v6, %v867_v54 }
 0x26e   : > { %v978_v13 = vmax.f32 %v962_v10, %v2439_v12 }
 0x26f   : > { %v1025_v7 = vpop.permute.xlu0 %1024  ;;  %v931_v37 = vpop.permute.xlu1 %930 }
 0x270   : > { %v963_v22 = vmax.f32 %v899_v11, %v931_v37  ;;  %v1058_v19 = vmax.f32 %v978_v13, %v1025_v7 }
 0x272   : > { %v979_v61 = vmax.f32 %v963_v22, %v2479_v39 }
 0x273   : > { %v1089_v26 = vpop.permute.xlu0 %1088  ;;  %v1027_v25 = vpop.permute.xlu1 %1026 }
 0x274   : > { %v1122_v52 = vmax.f32 %v1058_v19, %v1089_v26  ;;  %v1059_v16 = vmax.f32 %v979_v61, %v1027_v25 }
 0x277   : > { %v1153_v30 = vpop.permute.xlu0 %1152  ;;  %v1091_v1 = vpop.permute.xlu1 %1090 }
 0x278   : > { %v1186_v17 = vmax.f32 %v1122_v52, %v1153_v30  ;;  %v1123_v42 = vmax.f32 %v1059_v16, %v1091_v1 }
 0x27a   : > { %v1202_v12 = vmax.f32 %v1186_v17, %v2255_v9  ;;  %v1345_v9 = vmax.f32 %v1281_v51, %v2469_v50 }
 0x27b   : > { %v1373_v35 = vpop.permute.xlu0 %1372  ;;  %v1155_v47 = vpop.permute.xlu1 %1154 }
 0x27c   : > { %v1408_v39 = vmax.f32 %v1344_v32, %v1373_v35  ;;  %v1187_v3 = vmax.f32 %v1123_v42, %v1155_v47  ;;  %v1282_v38 = vmax.f32 %v1202_v12, %v2506_v43 }
 0x27e   : > { %v1431_v23 = vadd.f32 %v2289_v34, %v1408_v39  ;;  %v1203_v62 = vmax.f32 %v1187_v3, %v2262_v0  ;;  %v1346_v8 = vmax.f32 %v1282_v38, %v2511_v41 }
 0x27f   : > { %v1377_v63 = vpop.permute.xlu0 %1376  ;;  %v1375_v5 = vpop.permute.xlu1 %1374 }
 0x280   : > { %v1447_v36 = vmax.f32 %v1431_v23, 0.0  ;;  %v1410_v59 = vmax.f32 %v1346_v8, %v1377_v63  ;;  %v1409_v60 = vmax.f32 %v1345_v9, %v1375_v5  ;;  %v1283_v44 = vmax.f32 %v1203_v62, %v2513_v48 }
 0x282   : > { %1464 = vst.msk [vmem:[%s2306_s23 + $0x60] sm:$0xff] %vm1451_vm0, %v1447_v36  ;;  %v1433_v43 = vadd.f32 %v2289_v34, %v1410_v59  ;;  %v1432_v0 = vadd.f32 %v2289_v34, %v1409_v60  ;;  %v1347_v41 = vmax.f32 %v1283_v44, %v2519_v15 }
 0x283   : > { %v1379_v18 = vpop.permute.xlu1 %1378 }
 0x284   : > { %v1449_v14 = vmax.f32 %v1433_v43, 0.0  ;;  %v1448_v50 = vmax.f32 %v1432_v0, 0.0  ;;  %v1411_v20 = vmax.f32 %v1347_v41, %v1379_v18 }
 0x286   : > { %1466 = vst.msk [vmem:[%s2306_s23 + $0x70] sm:$0xff] %vm1451_vm0, %v1449_v14  ;;  %1465 = vst.msk [vmem:[%s2306_s23 + $0x68] sm:$0xff] %vm1451_vm0, %v1448_v50  ;;  %v1434_v49 = vadd.f32 %v2289_v34, %v1411_v20 }
 0x288   : > { %v1450_v4 = vmax.f32 %v1434_v49, 0.0 }
 0x28a   : > { %1467 = vst.msk [vmem:[%s2306_s23 + $0x78] sm:$0xff] %vm1451_vm0, %v1450_v4 }
 0x28b PF: > { %s13_s12 = sadd.s32 1, %s1731_s12  }
 0x28c   : > { %p10_p4 = scmp.ge.s32.totalorder %s13_s12, 4  }
 0x28e   :  { %12 = sbr.rel (!%p10_p4) target bundleno = 1 (0x1), region = 62 }

</bundles_post_ra>
